<compile_context>
chip_gen: v6e
topology: v6e:2x2x1
jax: 0.10.0
libtpu: 0.0.40
codegen_flags: <defaults>
</compile_context>

<pallas_src>
import jax
import jax.numpy as jnp
from jax.experimental import pallas as pl
from jax.experimental.pallas import tpu as pltpu


_LANES = 128                          # TPU lane width
_MAX_COLS = 4096                      # lane-dense slab width cap
_TARGET_TILE_BYTES = 2 * 1024 * 1024  # ~2 MiB per block -> <= 8 MiB resident VMEM


# ----------------------------------------------------------------------------
# Kernel: identity copy of one (block_rows, cols) tile.
# ----------------------------------------------------------------------------
def _copy_kernel(x_ref, o_ref):
    o_ref[...] = x_ref[...]


def _choose_layout(n, itemsize):
    """Pick (rows, cols, block_rows) for a lane-dense tiled copy, or None."""
    if n == 0 or n % _LANES != 0:
        return None

    # Widest multiple-of-128 column count (<= _MAX_COLS) that divides n.
    cols = _LANES
    for k in range(_MAX_COLS // _LANES, 0, -1):
        c = _LANES * k
        if n % c == 0:
            cols = c
            break
    rows = n // cols

    # Dtype-aware sublane multiple: 8 (f32), 16 (bf16), 32 (int8/fp8).
    sub = max(8, 32 // max(1, itemsize))
    target_rows = max(sub, _TARGET_TILE_BYTES // (cols * itemsize))

    # Largest divisor of `rows` that is a multiple of `sub` and <= target_rows.
    block_rows = None
    for r in range(min(rows, target_rows), sub - 1, -1):
        if r % sub == 0 and rows % r == 0:
            block_rows = r
            break
    if block_rows is None:
        # No aligned divisor: take the whole slab in one block if it is small
        # enough (block == full array dims is always a legal block shape).
        if rows * cols * itemsize <= 4 * _TARGET_TILE_BYTES:
            block_rows = rows
        else:
            return None
    return rows, cols, block_rows


def _pallas_reshape_copy(x, target_shape):
    n = int(x.size)
    layout = _choose_layout(n, jnp.dtype(x.dtype).itemsize)
    if layout is None:
        # Not lane-aligned (or huge ragged slab): reshape is metadata-only,
        # the fastest "kernel" is no kernel.
        return jnp.reshape(x, target_shape)

    rows, cols, block_rows = layout
    x2d = x.reshape(rows, cols)  # row-major flatten; no pad, no slice

    out2d = pl.pallas_call(
        _copy_kernel,
        out_shape=jax.ShapeDtypeStruct((rows, cols), x2d.dtype),
        grid=(rows // block_rows,),
        in_specs=[pl.BlockSpec((block_rows, cols), lambda i: (i, 0))],
        out_specs=pl.BlockSpec((block_rows, cols), lambda i: (i, 0)),
        compiler_params=pltpu.CompilerParams(
            dimension_semantics=("parallel",)
        ),
    )(x2d)

    # Final reshape is metadata-only; supports torch-style -1 wildcard too.
    return out2d.reshape(target_shape)


# ----------------------------------------------------------------------------
# Module-equivalent wrapper.
# ----------------------------------------------------------------------------
class Reshape:
    """JAX/Pallas equivalent of the PyTorch Reshape utility module."""

    def __init__(self, *args: int):
        self.shape = args

    def __call__(self, x: jax.Array) -> jax.Array:
        # torch .view aliases storage; here we either return a metadata-only
        # reshape or a single bandwidth-bound Pallas copy with identical
        # element order.  (input_output_aliases could halve HBM traffic if
        # in-place/donated semantics were acceptable; not used since callers
        # may keep using x, as torch .view allows.)
        return _pallas_reshape_copy(x, self.shape)


if __name__ == "__main__":
    key = jax.random.PRNGKey(0)

    # NCHW conv feature map about to be flattened for an FC head:
    # (batch=2, channels=4, H=16, W=16) -> (2, 1024)
    x = jax.random.normal(key, (2, 4, 16, 16), dtype=jnp.float32)
    y = jax.block_until_ready(Reshape(2, 4 * 16 * 16)(x))
    assert y.shape == (2, 1024) and y.dtype == x.dtype
    assert bool(jnp.array_equal(y, x.reshape(2, 1024)))

    # Medium lane-aligned tensor (exercises the wide-slab layout chooser).
    x2 = jax.random.normal(jax.random.PRNGKey(1), (2, 8, 32, 32), dtype=jnp.float32)
    y2 = jax.block_until_ready(Reshape(2, 8 * 32 * 32)(x2))
    assert bool(jnp.array_equal(y2, x2.reshape(2, 8 * 32 * 32)))

    # Ragged size (not a multiple of 128) -> metadata-only fallback path.
    x3 = jax.random.normal(jax.random.PRNGKey(2), (3, 5, 7), dtype=jnp.float32)
    y3 = jax.block_until_ready(Reshape(105)(x3))
    assert bool(jnp.array_equal(y3, x3.reshape(105)))

    print("KERNEL_OK")
</pallas_src>

<mosaic_0001>
module attributes {stable_mosaic.version = 11 : i64} {
  func.func @_copy_kernel(%arg0: i32, %arg1: memref<1x2048xf32, #tpu.memory_space<vmem>>, %arg2: memref<1x2048xf32, #tpu.memory_space<vmem>>) attributes {dimension_semantics = [#tpu.dimension_semantics<parallel>], iteration_bounds = array<i64: 1>, scalar_prefetch = 0 : i64, scratch_operands = 0 : i64, tpu.core_type = #tpu.core_type<tc>, window_params = [{transform_indices = @transform_0, window_bounds = array<i64: 1, 2048>}, {transform_indices = @transform_1, window_bounds = array<i64: 1, 2048>}]} {
    %c0 = arith.constant 0 : index
    %c0_0 = arith.constant 0 : index
    %0 = vector.load %arg1[%c0, %c0_0] : memref<1x2048xf32, #tpu.memory_space<vmem>>, vector<1x2048xf32>
    %c0_1 = arith.constant 0 : index
    %c0_2 = arith.constant 0 : index
    %1 = vector.load %arg2[%c0_1, %c0_2] : memref<1x2048xf32, #tpu.memory_space<vmem>>, vector<1x2048xf32>
    tpu.vector_store %arg2[%c0_1, %c0_2], %0 {strides = array<i32>} : memref<1x2048xf32, #tpu.memory_space<vmem>>, vector<1x2048xf32>,
    return
  }
  func.func @transform_0(%arg0: i32) -> (i32, i32) {
    %c0_i32 = arith.constant 0 : i32
    %c0_i32_0 = arith.constant 0 : i32
    return %arg0, %c0_i32 : i32, i32
  }
  func.func @transform_1(%arg0: i32) -> (i32, i32) {
    %c0_i32 = arith.constant 0 : i32
    %c0_i32_0 = arith.constant 0 : i32
    return %arg0, %c0_i32 : i32, i32
  }
}

</mosaic_0001>

<bundles_post_ra>
// kernel: tpu_custom_call.1
= control target key start
LH: loop header
LB: loop body
LE: loop exit
PB: predicated region body
PF: predicated region fallthrough
CT: control target
= control target key end

     0   :  { %6 = vsyncpa [#allocation3], 0  ;;  %s104_s0 = inlined_call_operand.hbm [shape: f32[1,2048], index: 0, kind: input, shape index: {}]   ;;  %s105_s1 = inlined_call_operand.hbm [shape: f32[1,2048], index: 1, kind: output, shape index: {}]  }
   0x1   :  { %7 = vsyncpa [#allocation4], 0  ;;  %s86_s6 = smov [#allocation2]  }
   0x2   :  { %s14_s7 = sshll.u32 %s86_s6, 4  ;;  %s15_s7 = int_to_ptr.vmem [resolvable:$true] %s14_s7 }
   0x3   :  { %s50_s8 = scalar_lea.vmem %s15_s7, 256  ;;  %p55_p1 = scmp.lt.s32.totalorder %s15_s7, %s15_s7 }
   0x4   :  { %p51_p0 = scmp.ne.s32.totalorder %s15_s7, %s50_s8  ;;  %p56_p2 = scmp.lt.s32.totalorder %s50_s8, %s50_s8 }
   0x6   :  { %p57_p3 = por %p56_p2, %p55_p1 }
   0x8   :  { %p58_p4 = pnand %p57_p3, %p51_p0 }
   0xa   :  { %61 = shalt.err (!%p58_p4)
}
   0xb   :  { %17 = dma.hbm_to_vmem [thread:$0]  %s104_s0, 256, %s15_s7, [#allocation3]  }
   0xc   :  { %82 = dma.done.wait [#allocation3], 256  }
   0xd   :  { %83 = vsyncadd [#allocation3], 4294967040  ;;  %s87_s11 = smov [#allocation5]   ;;  %v21_v0 = vld [vmem:[#allocation2] sm:$0xff]  ;;  %v22_v1 = vld [vmem:[#allocation2 + $0x8] sm:$0xff] }
   0xe   :  { %s31_s12 = sshll.u32 %s87_s11, 4  ;;  %23 = vst [vmem:[#allocation5] sm:$0xff] %v21_v0  ;;  %24 = vst [vmem:[#allocation5 + $0x8] sm:$0xff] %v22_v1  ;;  %s32_s12 = int_to_ptr.vmem [resolvable:$true] %s31_s12 }
   0xf   :  { %s62_s13 = scalar_lea.vmem %s32_s12, 256  ;;  %p67_p6 = scmp.lt.s32.totalorder %s32_s12, %s32_s12 }
  0x10   :  { %p63_p5 = scmp.ne.s32.totalorder %s32_s12, %s62_s13  ;;  %p68_p7 = scmp.lt.s32.totalorder %s62_s13, %s62_s13 }
  0x12   :  { %p69_p8 = por %p68_p7, %p67_p6 }
  0x14   :  { %p70_p9 = pnand %p69_p8, %p63_p5 }
  0x16   :  { %73 = shalt.err (!%p70_p9)
}
  0x17   :  { %34 = dma.vmem_to_hbm [thread:$0]  %s32_s12, 256, %s105_s1, [#allocation4]  }
  0x18   :  { %84 = dma.done.wait [#allocation4], 256  }
  0x19   :  { %85 = vsyncadd [#allocation4], 4294967040 }
  0x1a   :  { %38 = vsyncpa [#allocation3], 1 }
  0x1b   :  { %39 = vsyncpa [#allocation4], 1 }

</bundles_post_ra>
